<compile_context>
chip_gen: v5e
topology: v5e:2x2
jax: 0.10.0
libtpu: 0.0.40
codegen_flags: <defaults>
</compile_context>

<pallas_src>
import functools

import jax
import jax.numpy as jnp
from jax.experimental import pallas as pl
from jax.experimental.pallas import tpu as pltpu

LANE = 128  # TPU lane width; output feature dim is padded to this.


def _qnet_kernel(x_ref, wb_ref, o_ref, *, in_features):
    # x_ref : (B, in_features)           f32
    # wb_ref: (in_features + 1, LANE)    f32 -- rows 0..in-1 = W (x @ W layout),
    #                                           row  in      = bias (lane-padded)
    # o_ref : (B, LANE)                  f32
    x = x_ref[...]
    wb = wb_ref[...]

    # Initialize the accumulator with the bias row (broadcast over batch).
    bias_row = wb[in_features:in_features + 1, :]            # (1, LANE)
    acc = jnp.broadcast_to(bias_row, o_ref.shape)            # (B, LANE)

    # K = in_features (= 3): unrolled VPU broadcast multiply-adds; keeps the
    # whole computation in vregs and off the MXU.
    for k in range(in_features):
        acc = acc + x[:, k:k + 1] * wb[k:k + 1, :]           # (B,1)*(1,LANE)

    o_ref[...] = acc                                         # lane-dense store


def pack_params(w, b, lane=LANE):
    """Pack parameters once, outside the hot path.

    w: (in_features, out_features) = W_pt.T ; b: (out_features,)
    Returns a single (in_features + 1, lane) f32 operand: weight rows followed
    by the bias row, zero-padded along the lane (output-feature) dimension.
    """
    in_f, out_f = w.shape
    wb = jnp.concatenate([w, b.reshape(1, out_f)], axis=0)    # (in+1, out)
    return jnp.pad(wb, ((0, 0), (0, lane - out_f)))           # (in+1, lane)


def qnet_forward(x, wb_packed, out_features):
    """x: (B, in_features) f32; wb_packed: (in_features+1, LANE) f32.

    Returns (B, out_features).
    """
    B, in_f = x.shape
    kernel = functools.partial(_qnet_kernel, in_features=in_f)
    y_pad = pl.pallas_call(
        kernel,
        out_shape=jax.ShapeDtypeStruct((B, LANE), x.dtype),
        in_specs=[
            pl.BlockSpec(memory_space=pltpu.MemorySpace.VMEM),  # x, whole array
            pl.BlockSpec(memory_space=pltpu.MemorySpace.VMEM),  # packed W+bias
        ],
        out_specs=pl.BlockSpec(memory_space=pltpu.MemorySpace.VMEM),
    )(x, wb_packed)
    # Strip the lane padding outside the kernel.
    return y_pad[:, :out_features]


def init_qnet_params(key, in_features=3, out_features=3):
    # Mimic PyTorch nn.Linear default init: U(-1/sqrt(in), 1/sqrt(in)).
    kw, kb = jax.random.split(key)
    bound = 1.0 / jnp.sqrt(jnp.float32(in_features))
    w_pt = jax.random.uniform(kw, (out_features, in_features), jnp.float32,
                              -bound, bound)
    b = jax.random.uniform(kb, (out_features,), jnp.float32, -bound, bound)
    # Store transposed so the kernel computes x @ w directly.
    return w_pt.T, b, w_pt


if __name__ == "__main__":
    key = jax.random.PRNGKey(0)
    # Input matching the reference script: cat(ones(1,3), 2*ones(1,3)) -> (2, 3)
    x = jnp.concatenate([jnp.ones((1, 3), jnp.float32),
                         2.0 * jnp.ones((1, 3), jnp.float32)], axis=0)

    w, b, w_pt = init_qnet_params(key)
    wb_packed = pack_params(w, b)            # one-time parameter packing

    out = qnet_forward(x, wb_packed, out_features=3)
    out = jax.block_until_ready(out)

    # Reference check against plain-JAX equivalent of F.linear(x, W_pt, b).
    ref = x @ w_pt.T + b
    assert out.shape == (2, 3)
    assert jnp.allclose(out, ref, atol=1e-5, rtol=1e-5)

    print("KERNEL_OK")
</pallas_src>

<mosaic_0001>
module attributes {stable_mosaic.version = 11 : i64} {
  func.func @_qnet_kernel(%arg0: memref<2x3xf32, #tpu.memory_space<vmem>>, %arg1: memref<4x128xf32, #tpu.memory_space<vmem>>, %arg2: memref<2x128xf32, #tpu.memory_space<vmem>>) attributes {dimension_semantics = [], scalar_prefetch = 0 : i64, scratch_operands = 0 : i64, tpu.core_type = #tpu.core_type<tc>} {
    %c0 = arith.constant 0 : index
    %c0_0 = arith.constant 0 : index
    %0 = vector.load %arg0[%c0, %c0_0] : memref<2x3xf32, #tpu.memory_space<vmem>>, vector<2x3xf32>
    %c0_1 = arith.constant 0 : index
    %c0_2 = arith.constant 0 : index
    %1 = vector.load %arg1[%c0_1, %c0_2] : memref<4x128xf32, #tpu.memory_space<vmem>>, vector<4x128xf32>
    %2 = vector.extract_strided_slice %1 {offsets = [3, 0], sizes = [1, 128], strides = [1, 1]} : vector<4x128xf32> to vector<1x128xf32>
    %3 = vector.shape_cast %2 : vector<1x128xf32> to vector<1x128xf32>
    %4 = vector.broadcast %3 : vector<1x128xf32> to vector<2x128xf32>
    %5 = vector.extract_strided_slice %0 {offsets = [0, 0], sizes = [2, 1], strides = [1, 1]} : vector<2x3xf32> to vector<2x1xf32>
    %6 = vector.extract_strided_slice %1 {offsets = [0, 0], sizes = [1, 128], strides = [1, 1]} : vector<4x128xf32> to vector<1x128xf32>
    %7 = vector.broadcast %5 : vector<2x1xf32> to vector<2x128xf32>
    %8 = vector.broadcast %6 : vector<1x128xf32> to vector<2x128xf32>
    %9 = arith.mulf %7, %8 : vector<2x128xf32>
    %10 = arith.addf %4, %9 : vector<2x128xf32>
    %11 = vector.extract_strided_slice %0 {offsets = [0, 1], sizes = [2, 1], strides = [1, 1]} : vector<2x3xf32> to vector<2x1xf32>
    %12 = vector.extract_strided_slice %1 {offsets = [1, 0], sizes = [1, 128], strides = [1, 1]} : vector<4x128xf32> to vector<1x128xf32>
    %13 = vector.broadcast %11 : vector<2x1xf32> to vector<2x128xf32>
    %14 = vector.broadcast %12 : vector<1x128xf32> to vector<2x128xf32>
    %15 = arith.mulf %13, %14 : vector<2x128xf32>
    %16 = arith.addf %10, %15 : vector<2x128xf32>
    %17 = vector.extract_strided_slice %0 {offsets = [0, 2], sizes = [2, 1], strides = [1, 1]} : vector<2x3xf32> to vector<2x1xf32>
    %18 = vector.extract_strided_slice %1 {offsets = [2, 0], sizes = [1, 128], strides = [1, 1]} : vector<4x128xf32> to vector<1x128xf32>
    %19 = vector.broadcast %17 : vector<2x1xf32> to vector<2x128xf32>
    %20 = vector.broadcast %18 : vector<1x128xf32> to vector<2x128xf32>
    %21 = arith.mulf %19, %20 : vector<2x128xf32>
    %22 = arith.addf %16, %21 : vector<2x128xf32>
    %c0_3 = arith.constant 0 : index
    %c0_4 = arith.constant 0 : index
    %23 = vector.load %arg2[%c0_3, %c0_4] : memref<2x128xf32, #tpu.memory_space<vmem>>, vector<2x128xf32>
    tpu.vector_store %arg2[%c0_3, %c0_4], %22 {strides = array<i32>} : memref<2x128xf32, #tpu.memory_space<vmem>>, vector<2x128xf32>,
    return
  }
}

</mosaic_0001>

<bundles_post_ra>
// kernel: tpu_custom_call.1
= control target key start
LH: loop header
LB: loop body
LE: loop exit
PB: predicated region body
PF: predicated region fallthrough
CT: control target
= control target key end

     0   :  { %7 = vsyncpa [#allocation3], 0  ;;  %s202_s0 = inlined_call_operand.hbm [shape: f32[2,3], index: 0, kind: input, shape index: {}]   ;;  %s203_s1 = inlined_call_operand.hbm [shape: f32[4,128], index: 1, kind: input, shape index: {}]   ;;  %s204_s2 = inlined_call_operand.hbm [shape: f32[2,128], index: 2, kind: output, shape index: {}]  }
   0x1   :  { %8 = vsyncpa [#allocation6], 0 }
   0x2   :  { %9 = vsyncpa [#allocation4], 0  ;;  %s15_s11 = sshll.u32 %s202_s0, 4  ;;  %s172_s12 = smov [#allocation2]   ;;  %s16_s11 = int_to_ptr.hbm [resolvable:$true] %s15_s11 }
   0x3   :  { %s17_s13 = sshll.u32 %s172_s12, 4  ;;  %s26_s16 = sshll.u32 %s203_s1, 4  ;;  %s18_s13 = int_to_ptr.vmem [resolvable:$true] %s17_s13  ;;  %s27_s16 = int_to_ptr.hbm [resolvable:$true] %s26_s16 }
   0x4   :  { %20 = dma.hbm_to_vmem [thread:$0]  %s16_s11, 32, %s18_s13, [#allocation3]  }
   0x5   :  { %s173_s17 = smov [#allocation5]  }
   0x6   :  { %s28_s18 = sshll.u32 %s173_s17, 4  ;;  %s29_s18 = int_to_ptr.vmem [resolvable:$true] %s28_s18 }
   0x7   :  { %31 = dma.hbm_to_vmem [thread:$0]  %s27_s16, 64, %s29_s18, [#allocation6]  }
   0x8   :  { %166 = dma.done.wait [#allocation3], 32  }
   0x9   :  { %167 = vsyncadd [#allocation3], 4294967264 }
   0xa   :  { %168 = dma.done.wait [#allocation6], 64  }
   0xb   :  { %169 = vsyncadd [#allocation6], 4294967232  ;;  %v174_v0 = vmov 0   ;;  %v175_v1 = vmov 2   ;;  %v40_v2 = vld [vmem:[#allocation2] sm:$0x3] }
   0xc   :  { %90 = vset.pattern.permute.xlu0 %v174_v0  ;;  %92 = vset.pattern.permute.xlu1 %v175_v1  ;;  %v176_v3 = vmov 1   ;;  %v41_v4 = vld [vmem:[#allocation5] sm:$0xf]  ;;  %s177_s0 = smov [#allocation7]   ;;  %s73_s21 = sshll.u32 %s204_s2, 4  ;;  %s74_s21 = int_to_ptr.hbm [resolvable:$true] %s73_s21 }
   0xd   :  { %45 = vperm.xlu0 %90, %v40_v2   ;;  %59 = vperm.xlu1 %92, %v40_v2   ;;  %v48_v6 = vperm.slane %v41_v4, 0  ;;  %v42_v7 = vperm.slane %v41_v4, 3  ;;  %v55_v9 = vperm.slane %v41_v4, 1  ;;  %v62_v10 = vperm.slane %v41_v4, 2  ;;  %s71_s1 = sshll.u32 %s177_s0, 4  ;;  %s72_s1 = int_to_ptr.vmem [resolvable:$true] %s71_s1 }
  0x15   :  { %91 = vset.pattern.permute.xlu0 %v176_v3 }
  0x16   :  { %52 = vperm.xlu0 %91, %v40_v2  }
  0x1e   :  { %93 = vset.pattern.permute.xlu0 %v175_v1 }
  0x7f   :  { %v46_v5 = vpop.permute.xlu0 %45  ;;  %v60_v11 = vpop.permute.xlu1 %59 }
  0x80   :  { %v49_v8 = vmul.f32 %v48_v6, %v46_v5  ;;  %v63_v15 = vmul.f32 %v62_v10, %v60_v11 }
  0x82   :  { %v50_v13 = vadd.f32 %v49_v8, %v42_v7 }
  0x88   :  { %v53_v12 = vpop.permute.xlu0 %52 }
  0x89   :  { %v56_v14 = vmul.f32 %v55_v9, %v53_v12 }
  0x8b   :  { %v57_v16 = vadd.f32 %v56_v14, %v50_v13 }
  0x8d   :  { %v64_v17 = vadd.f32 %v63_v15, %v57_v16 }
  0x8f   :  { %65 = vst [vmem:[#allocation7] sm:$0x3] %v64_v17 }
  0x90   :  { %76 = dma.vmem_to_hbm [thread:$0]  %s72_s1, 32, %s74_s21, [#allocation4]  }
  0x91   :  { %170 = dma.done.wait [#allocation4], 32  }
  0x92   :  { %171 = vsyncadd [#allocation4], 4294967264 }
  0x93   :  { %81 = vsyncpa [#allocation3], 1 }
  0x94   :  { %82 = vsyncpa [#allocation6], 1 }
  0x95   :  { %83 = vsyncpa [#allocation4], 1 }

</bundles_post_ra>
